<compile_context>
chip_gen: v7x
topology: tpu7x:2x2x1
jax: 0.10.0
libtpu: 0.0.40
codegen_flags: <defaults>
</compile_context>

<pallas_src>
import numpy as np
import jax
import jax.numpy as jnp
from jax import lax
from jax.experimental import pallas as pl
from jax.experimental.pallas import tpu as pltpu


def _convap_kernel(x_ref, pt_ref, icnt_ref, wt_ref, b_ref, o_ref, acc_ref):
    # x_ref   : [1, C_in, t_hw]  activation slab (native dtype, channel-major = pure NCHW reshape)
    # pt_ref  : [t_hw, S]        0/1 adaptive-pool membership (same dtype as x; 0/1 exact)
    # icnt_ref: [1, S]           f32 reciprocal bin sizes
    # wt_ref  : [C_in, C_out]    f32 1x1-conv weight (pre-transposed)
    # b_ref   : [1, C_out]       f32 bias
    # o_ref   : [1, S, C_out]    lane-dense output (C_out on lanes)
    # acc_ref : [C_in, S]        f32 scratch, per-bin spatial sums
    k = pl.program_id(1)

    @pl.when(k == 0)
    def _():
        acc_ref[...] = jnp.zeros_like(acc_ref)

    # Pool-first: accumulate per-bin spatial sums.  [C_in, t_hw] @ [t_hw, S] -> [C_in, S]
    acc_ref[...] += jnp.dot(x_ref[0], pt_ref[...], preferred_element_type=jnp.float32)

    @pl.when(k == pl.num_programs(1) - 1)
    def _():
        mean = acc_ref[...] * icnt_ref[...]                         # [C_in, S]  (sums -> means)
        # Flipped finalize: pooled[S, C_out] = mean^T @ W^T  (tiny trans-LHS matmul,
        # lane-dense result), bias broadcast over lanes.
        pooled = lax.dot_general(
            mean, wt_ref[...],
            dimension_numbers=(((0,), (0,)), ((), ())),
            preferred_element_type=jnp.float32) + b_ref[...]        # [S, C_out]
        # L2 normalize over all S*C_out elements of this batch item (F.normalize, eps=1e-12).
        sq = jnp.sum(pooled * pooled)
        inv = lax.rsqrt(jnp.maximum(sq, 1e-24))                     # == 1 / max(||.||, 1e-12)
        o_ref[0] = (pooled * inv).astype(o_ref.dtype)


def _adaptive_pool_tables(H, W, s1, s2):
    """Binary membership matrix P^T:[H*W, s1*s2] and inverse bin sizes [1, s1*s2] reproducing
    AdaptiveAvgPool2d((s1, s2)) on the flattened spatial axis (handles non-divisible H/W)."""
    S = s1 * s2
    pt = np.zeros((H * W, S), dtype=np.float32)
    inv_cnt = np.zeros((1, S), dtype=np.float32)
    for i in range(s1):
        h0 = (i * H) // s1
        h1 = -((-(i + 1) * H) // s1)          # ceil((i+1)*H/s1)
        for j in range(s2):
            w0 = (j * W) // s2
            w1 = -((-(j + 1) * W) // s2)
            col = i * s2 + j
            inv_cnt[0, col] = 1.0 / ((h1 - h0) * (w1 - w0))
            for h in range(h0, h1):
                for w in range(w0, w1):
                    pt[h * W + w, col] = 1.0
    return pt, inv_cnt


def _vmem_capacity_bytes():
    try:
        info = pltpu.get_tpu_info()
        cap = getattr(info, "vmem_capacity_bytes", None)
        if cap:
            return int(cap)
    except Exception:
        pass
    return 64 * 1024 * 1024   # conservative: v7x per-TensorCore


def _plan_hw(HW, C_in, itemsize, vmem_cap):
    """Return (HW_padded, t_hw).  Budgets ~1/4 of VMEM for the double-buffered x + pool-table
    streams (pool-table block counted at its lane-padded 128-lane footprint)."""
    per_elem = (C_in + 128) * itemsize * 2          # per t_hw element, double-buffered
    if HW % 128 != 0:
        if HW * per_elem <= 4 * 1024 * 1024:
            return HW, HW                           # single full-extent block, no padding pass
        HW_pad = ((HW + 127) // 128) * 128          # zero-pad spatially (zero pt rows => exact)
    else:
        HW_pad = HW
    target_elems = max(128, (vmem_cap // 4) // per_elem)
    t = max(128, min(HW_pad, (target_elems // 128) * 128))
    while HW_pad % t != 0:
        t -= 128
    return HW_pad, t


def convap_forward(x, conv_w, conv_b, s1=2, s2=2, compute_dtype=None):
    """x: [B, C_in, H, W] (NCHW). conv_w: [C_out, C_in, 1, 1]. conv_b: [C_out].
    Returns [B, C_out*s1*s2], matching the PyTorch module's forward.
    compute_dtype=None streams x in its native dtype (no extra convert pass)."""
    B, C_in, H, W = x.shape
    C_out = conv_w.shape[0]
    S = s1 * s2
    HW = H * W

    xdt = x.dtype if compute_dtype is None else jnp.dtype(compute_dtype)
    itemsize = jnp.dtype(xdt).itemsize

    # Channel-major activation: a pure reshape of NCHW (no transpose / extra HBM pass).
    x_cm = x.reshape(B, C_in, HW)
    if x_cm.dtype != xdt:
        x_cm = x_cm.astype(xdt)          # only when the caller explicitly asks for it

    vmem_cap = _vmem_capacity_bytes()
    HW_pad, t_hw = _plan_hw(HW, C_in, itemsize, vmem_cap)
    if HW_pad != HW:
        x_cm = jnp.pad(x_cm, ((0, 0), (0, 0), (0, HW_pad - HW)))

    pt_np, icnt_np = _adaptive_pool_tables(H, W, s1, s2)
    if HW_pad != HW:
        pt_np = np.pad(pt_np, ((0, HW_pad - HW), (0, 0)))   # zero rows: sums unchanged
    pool_t = jnp.asarray(pt_np, dtype=xdt)                  # 0/1 -> exact in bf16/f32
    inv_cnt = jnp.asarray(icnt_np, dtype=jnp.float32)

    # Pre-transposed weight [C_in, C_out] and lane-broadcast bias [1, C_out] (tiny XLA ops).
    wt = jnp.asarray(conv_w, jnp.float32).reshape(C_out, C_in).T
    bias = jnp.asarray(conv_b, jnp.float32).reshape(1, C_out)

    grid = (B, HW_pad // t_hw)

    vmem_limit = max(32 * 1024 * 1024, min(vmem_cap * 3 // 4, 96 * 1024 * 1024))
    cost = pl.CostEstimate(
        flops=int(2 * B * C_in * HW * S + 2 * B * S * C_in * C_out),
        transcendentals=int(B),
        bytes_accessed=int(B * C_in * HW_pad * itemsize + B * HW_pad * S * itemsize
                           + C_in * C_out * 4 + B * S * C_out * 4),
    )

    out = pl.pallas_call(
        _convap_kernel,
        out_shape=jax.ShapeDtypeStruct((B, S, C_out), jnp.float32),
        grid_spec=pltpu.PrefetchScalarGridSpec(
            num_scalar_prefetch=0,
            grid=grid,
            in_specs=[
                pl.BlockSpec((1, C_in, t_hw), lambda b, k: (b, 0, k)),   # x (streamed over HW)
                pl.BlockSpec((t_hw, S), lambda b, k: (k, 0)),            # P^T tile
                pl.BlockSpec((1, S), lambda b, k: (0, 0)),               # 1/bin_size (invariant)
                pl.BlockSpec((C_in, C_out), lambda b, k: (0, 0)),        # W^T (invariant)
                pl.BlockSpec((1, C_out), lambda b, k: (0, 0)),           # bias (invariant)
            ],
            out_specs=pl.BlockSpec((1, S, C_out), lambda b, k: (b, 0, 0)),
            scratch_shapes=[pltpu.VMEM((C_in, S), jnp.float32)],
        ),
        compiler_params=pltpu.CompilerParams(
            dimension_semantics=("parallel", "arbitrary"),
            vmem_limit_bytes=int(vmem_limit),
        ),
        cost_estimate=cost,
    )(x_cm, pool_t, inv_cnt, wt, bias)

    # [B, S, C_out] -> torch flatten(1) order of [B, C_out, s1, s2] (tiny reorder on the result;
    # the L2 norm is permutation-invariant so in-kernel normalization is unchanged).
    return out.transpose(0, 2, 1).reshape(B, C_out * S)


def _reference(x, conv_w, conv_b, s1, s2):
    """General numpy reference of the PyTorch forward (handles non-divisible adaptive bins)."""
    B, C_in, H, W = x.shape
    C_out = conv_w.shape[0]
    xn = np.asarray(x, np.float64)
    w = np.asarray(conv_w, np.float64).reshape(C_out, C_in)
    b = np.asarray(conv_b, np.float64)
    y = np.einsum("bchw,oc->bohw", xn, w) + b[None, :, None, None]
    pooled = np.zeros((B, C_out, s1, s2), dtype=np.float64)
    for i in range(s1):
        h0, h1 = (i * H) // s1, -((-(i + 1) * H) // s1)
        for j in range(s2):
            w0, w1 = (j * W) // s2, -((-(j + 1) * W) // s2)
            pooled[:, :, i, j] = y[:, :, h0:h1, w0:w1].mean(axis=(2, 3))
    flat = pooled.reshape(B, -1)
    n = np.maximum(np.linalg.norm(flat, axis=1, keepdims=True), 1e-12)
    return flat / n


if __name__ == "__main__":
    key = jax.random.PRNGKey(0)

    # Case 1: the canonical ConvAP configuration (divisible pooling), small shapes.
    B, C_in, H, W = 2, 4, 16, 16
    C_out, s1, s2 = 8, 2, 2
    kx, kw, kb, key = jax.random.split(key, 4)
    x = jax.random.normal(kx, (B, C_in, H, W), dtype=jnp.float32)
    conv_w = jax.random.normal(kw, (C_out, C_in, 1, 1), dtype=jnp.float32) * 0.1
    conv_b = jax.random.normal(kb, (C_out,), dtype=jnp.float32) * 0.1

    out = jax.block_until_ready(convap_forward(x, conv_w, conv_b, s1=s1, s2=s2))
    ref = _reference(x, conv_w, conv_b, s1, s2)
    assert out.shape == (B, C_out * s1 * s2), out.shape
    np.testing.assert_allclose(np.asarray(out), ref, rtol=1e-3, atol=1e-3)

    # Case 2: non-divisible adaptive bins + HW not a multiple of 128 (full-extent block path).
    B2, C_in2, H2, W2 = 1, 6, 10, 10
    C_out2, t1, t2 = 16, 3, 3
    kx2, kw2, kb2, key = jax.random.split(key, 4)
    x2 = jax.random.normal(kx2, (B2, C_in2, H2, W2), dtype=jnp.float32)
    conv_w2 = jax.random.normal(kw2, (C_out2, C_in2, 1, 1), dtype=jnp.float32) * 0.1
    conv_b2 = jax.random.normal(kb2, (C_out2,), dtype=jnp.float32) * 0.1

    out2 = jax.block_until_ready(convap_forward(x2, conv_w2, conv_b2, s1=t1, s2=t2))
    ref2 = _reference(x2, conv_w2, conv_b2, t1, t2)
    assert out2.shape == (B2, C_out2 * t1 * t2), out2.shape
    np.testing.assert_allclose(np.asarray(out2), ref2, rtol=1e-3, atol=1e-3)

    print("KERNEL_OK")
</pallas_src>

<mosaic_0001>
module attributes {stable_mosaic.version = 11 : i64} {
  func.func @_convap_kernel(%arg0: i32, %arg1: i32, %arg2: memref<1x4x256xf32, #tpu.memory_space<vmem>>, %arg3: memref<256x4xf32, #tpu.memory_space<vmem>>, %arg4: memref<1x4xf32, #tpu.memory_space<vmem>>, %arg5: memref<4x8xf32, #tpu.memory_space<vmem>>, %arg6: memref<1x8xf32, #tpu.memory_space<vmem>>, %arg7: memref<1x4x8xf32, #tpu.memory_space<vmem>>, %arg8: memref<4x4xf32, #tpu.memory_space<vmem>>) attributes {dimension_semantics = [#tpu.dimension_semantics<parallel>, #tpu.dimension_semantics<arbitrary>], iteration_bounds = array<i64: 2, 1>, scalar_prefetch = 0 : i64, scratch_operands = 1 : i64, tpu.core_type = #tpu.core_type<tc>, window_params = [{transform_indices = @transform_0, window_bounds = array<i64: 1, 4, 256>}, {transform_indices = @transform_1, window_bounds = array<i64: 256, 4>}, {pipeline_mode = #tpu.pipeline_mode<synchronous>, transform_indices = @transform_2, window_bounds = array<i64: 1, 4>}, {pipeline_mode = #tpu.pipeline_mode<synchronous>, transform_indices = @transform_3, window_bounds = array<i64: 4, 8>}, {pipeline_mode = #tpu.pipeline_mode<synchronous>, transform_indices = @transform_4, window_bounds = array<i64: 1, 8>}, {transform_indices = @transform_5, window_bounds = array<i64: 1, 4, 8>}]} {
    %c0_i32 = arith.constant 0 : i32
    %0 = arith.cmpi eq, %arg1, %c0_i32 : i32
    %1 = arith.extui %0 : i1 to i32
    %c0_i32_0 = arith.constant 0 : i32
    %2 = arith.cmpi ne, %1, %c0_i32_0 : i32
    scf.if %2 {
      %cst_11 = arith.constant 0.000000e+00 : f32
      %13 = vector.broadcast %cst_11 : f32 to vector<4x4xf32>
      %c0_12 = arith.constant 0 : index
      %c0_13 = arith.constant 0 : index
      %14 = vector.load %arg8[%c0_12, %c0_13] : memref<4x4xf32, #tpu.memory_space<vmem>>, vector<4x4xf32>
      tpu.vector_store %arg8[%c0_12, %c0_13], %13 {strides = array<i32>} : memref<4x4xf32, #tpu.memory_space<vmem>>, vector<4x4xf32>,
    } else {
    }
    %c0 = arith.constant 0 : index
    %c0_1 = arith.constant 0 : index
    %3 = vector.load %arg8[%c0, %c0_1] : memref<4x4xf32, #tpu.memory_space<vmem>>, vector<4x4xf32>
    %c0_2 = arith.constant 0 : index
    %c0_3 = arith.constant 0 : index
    %c0_4 = arith.constant 0 : index
    %4 = vector.load %arg2[%c0_2, %c0_3, %c0_4] : memref<1x4x256xf32, #tpu.memory_space<vmem>>, vector<1x4x256xf32>
    %5 = vector.shape_cast %4 : vector<1x4x256xf32> to vector<4x256xf32>
    %c0_5 = arith.constant 0 : index
    %c0_6 = arith.constant 0 : index
    %6 = vector.load %arg3[%c0_5, %c0_6] : memref<256x4xf32, #tpu.memory_space<vmem>>, vector<256x4xf32>
    %cst = arith.constant dense<0.000000e+00> : vector<4x4xf32>
    %7 = tpu.matmul %5, %6, %cst {dimension_numbers = #tpu.dot_dimension_numbers<[1], [0], [0], [1], [0, 0, 1, 1], [], []>} : vector<4x256xf32>, vector<256x4xf32>, vector<4x4xf32> -> vector<4x4xf32>
    %8 = arith.addf %3, %7 : vector<4x4xf32>
    %c0_7 = arith.constant 0 : index
    %c0_8 = arith.constant 0 : index
    %9 = vector.load %arg8[%c0_7, %c0_8] : memref<4x4xf32, #tpu.memory_space<vmem>>, vector<4x4xf32>
    tpu.vector_store %arg8[%c0_7, %c0_8], %8 {strides = array<i32>} : memref<4x4xf32, #tpu.memory_space<vmem>>, vector<4x4xf32>,
    %c0_i32_9 = arith.constant 0 : i32
    %10 = arith.cmpi eq, %arg1, %c0_i32_9 : i32
    %11 = arith.extui %10 : i1 to i32
    %c0_i32_10 = arith.constant 0 : i32
    %12 = arith.cmpi ne, %11, %c0_i32_10 : i32
    scf.if %12 {
      %c0_11 = arith.constant 0 : index
      %c0_12 = arith.constant 0 : index
      %13 = vector.load %arg8[%c0_11, %c0_12] : memref<4x4xf32, #tpu.memory_space<vmem>>, vector<4x4xf32>
      %c0_13 = arith.constant 0 : index
      %c0_14 = arith.constant 0 : index
      %14 = vector.load %arg4[%c0_13, %c0_14] : memref<1x4xf32, #tpu.memory_space<vmem>>, vector<1x4xf32>
      %15 = vector.broadcast %14 : vector<1x4xf32> to vector<4x4xf32>
      %16 = arith.mulf %13, %15 : vector<4x4xf32>
      %c0_15 = arith.constant 0 : index
      %c0_16 = arith.constant 0 : index
      %17 = vector.load %arg5[%c0_15, %c0_16] : memref<4x8xf32, #tpu.memory_space<vmem>>, vector<4x8xf32>
      %cst_17 = arith.constant dense<0.000000e+00> : vector<4x8xf32>
      %18 = tpu.matmul %16, %17, %cst_17 {dimension_numbers = #tpu.dot_dimension_numbers<[0], [0], [1], [1], [0, 1, 1, 1], [], []>} : vector<4x4xf32>, vector<4x8xf32>, vector<4x8xf32> -> vector<4x8xf32>
      %c0_18 = arith.constant 0 : index
      %c0_19 = arith.constant 0 : index
      %19 = vector.load %arg6[%c0_18, %c0_19] : memref<1x8xf32, #tpu.memory_space<vmem>>, vector<1x8xf32>
      %20 = vector.broadcast %19 : vector<1x8xf32> to vector<4x8xf32>
      %21 = arith.addf %18, %20 : vector<4x8xf32>
      %22 = arith.mulf %21, %21 : vector<4x8xf32>
      %23 = vector.shape_cast %22 : vector<4x8xf32> to vector<1x4x8xf32>
      %cst_20 = arith.constant dense<0.000000e+00> : vector<1xf32>
      %24 = vector.multi_reduction <add>, %23, %cst_20 [1, 2] : vector<1x4x8xf32> to vector<1xf32>
      %25 = vector.shape_cast %24 : vector<1xf32> to vector<1x1x1xf32>
      %26 = vector.extract %25[0, 0, 0] : f32 from vector<1x1x1xf32>
      %cst_21 = arith.constant 1.000000e-24 : f32
      %27 = arith.maximumf %26, %cst_21 : f32
      %28 = math.rsqrt %27 : f32
      %29 = vector.broadcast %28 : f32 to vector<4x8xf32>
      %30 = arith.mulf %21, %29 : vector<4x8xf32>
      %c0_22 = arith.constant 0 : index
      %c0_23 = arith.constant 0 : index
      %c0_24 = arith.constant 0 : index
      %31 = vector.load %arg7[%c0_22, %c0_23, %c0_24] : memref<1x4x8xf32, #tpu.memory_space<vmem>>, vector<1x4x8xf32>
      %32 = vector.shape_cast %31 : vector<1x4x8xf32> to vector<4x8xf32>
      %33 = vector.shape_cast %30 : vector<4x8xf32> to vector<1x4x8xf32>
      tpu.vector_store %arg7[%c0_22, %c0_23, %c0_24], %33 {strides = array<i32>} : memref<1x4x8xf32, #tpu.memory_space<vmem>>, vector<1x4x8xf32>,
    } else {
    }
    return
  }
  func.func @transform_0(%arg0: i32, %arg1: i32) -> (i32, i32, i32) {
    %c0_i32 = arith.constant 0 : i32
    %c0_i32_0 = arith.constant 0 : i32
    return %arg0, %c0_i32, %arg1 : i32, i32, i32
  }
  func.func @transform_1(%arg0: i32, %arg1: i32) -> (i32, i32) {
    %c0_i32 = arith.constant 0 : i32
    %c0_i32_0 = arith.constant 0 : i32
    return %arg1, %c0_i32 : i32, i32
  }
  func.func @transform_2(%arg0: i32, %arg1: i32) -> (i32, i32) {
    %c0_i32 = arith.constant 0 : i32
    %c0_i32_0 = arith.constant 0 : i32
    %c0_i32_1 = arith.constant 0 : i32
    return %c0_i32, %c0_i32_0 : i32, i32
  }
  func.func @transform_3(%arg0: i32, %arg1: i32) -> (i32, i32) {
    %c0_i32 = arith.constant 0 : i32
    %c0_i32_0 = arith.constant 0 : i32
    %c0_i32_1 = arith.constant 0 : i32
    return %c0_i32, %c0_i32_0 : i32, i32
  }
  func.func @transform_4(%arg0: i32, %arg1: i32) -> (i32, i32) {
    %c0_i32 = arith.constant 0 : i32
    %c0_i32_0 = arith.constant 0 : i32
    %c0_i32_1 = arith.constant 0 : i32
    return %c0_i32, %c0_i32_0 : i32, i32
  }
  func.func @transform_5(%arg0: i32, %arg1: i32) -> (i32, i32, i32) {
    %c0_i32 = arith.constant 0 : i32
    %c0_i32_0 = arith.constant 0 : i32
    %c0_i32_1 = arith.constant 0 : i32
    return %arg0, %c0_i32, %c0_i32_0 : i32, i32, i32
  }
}

</mosaic_0001>

<bundles_post_ra>
// kernel: tpu_custom_call.1
= control target key start
LH: loop header
LB: loop body
LE: loop exit
PB: predicated region body
PF: predicated region fallthrough
CT: control target
= control target key end

     0   :  { %10 = vsyncpa [#allocation4], 0  ;;  %s1130_s0 = inlined_call_operand.vmem [shape: f32[2,4,256], index: 0, kind: input, shape index: {}]   ;;  %s1131_s1 = inlined_call_operand.vmem [shape: f32[256,4], index: 1, kind: input, shape index: {}]   ;;  %s1132_s2 = inlined_call_operand.vmem [shape: f32[1,4], index: 2, kind: input, shape index: {}]   ;;  %s1133_s3 = inlined_call_operand.vmem [shape: f32[4,8], index: 3, kind: input, shape index: {}]   ;;  %s1134_s4 = inlined_call_operand.vmem [shape: f32[1,8], index: 4, kind: input, shape index: {}]   ;;  %s1135_s5 = inlined_call_operand.hbm [shape: f32[2,4,8], index: 5, kind: output, shape index: {}]  }
   0x1   :  { %12 = vsyncpa [#allocation4 + $0x1], 0  ;;  %s911_s18 = smov 0   ;;  %s913_s19 = smov 0  }
   0x2   :  { %s915_s20 = smov 0   ;;  %s917_s21 = smov 0  }
   0x3   :  { %s919_s22 = smov 0   ;;  %s921_s23 = smov 0  }
   0x4 LB: > { %s640_s24 = sadd.s32 4294967295, %s875_s23   ;;  %s641_s25 = sadd.s32 4294967294, %s875_s23   ;;  %s875_s23 = sphi %s921_s23, %s18_s23   ;;  %s871_s22 = sphi %s919_s22, %s1142_s22   ;;  %s867_s21 = sphi %s917_s21, %s1141_s21   ;;  %s863_s20 = sphi %s915_s20, %s1140_s20   ;;  %s859_s19 = sphi %s913_s19, %s1139_s19   ;;  %s855_s18 = sphi %s911_s18, %s1138_s18  }
   0x5   : > { %s30_s26 = sadd.s32 1, %s871_s22  ;;  %s154_s27 = sadd.s32 1, %s863_s20 }
   0x6   : > { %p32_p0 = scmp.ge.s32.totalorder %s30_s26, 2  ;;  %p164_p1 = scmp.ne.s32.totalorder %s863_s20, %s859_s19 }
   0x7   : > { %p165_p2 = scmp.eq.s32.totalorder %s640_s24, 1  ;;  %p170_p3 = scmp.ne.s32.totalorder %s859_s19, %s855_s18 }
   0x8   : > { %s1144_s26 = smov (%p32_p0, %s30_s26), 0  ;;  %p171_p5 = scmp.eq.s32.totalorder %s641_s25, 1 }
   0x9   : > { %p951_p4 = por %p165_p2, %p164_p1  ;;  %s151_s29 = ssub.s32 %s871_s22, %s1144_s26 }
   0xa   : > { %p645_p6 = scmp.ge.s32.totalorder %s875_s23, 1  ;;  %p152_p7 = scmp.eq.s32.totalorder %s151_s29, 0 }
   0xb   : > { %p958_p8 = por %p171_p5, %p170_p3  ;;  %p220_p9 = scmp.lt.s32.totalorder %s875_s23, 3 }
   0xc   : > { %s964_s6 = scalar_select %p152_p7, %s863_s20, %s154_s27  }
   0xd   : > { %p221_p10 = pnand %p645_p6, %p220_p9 }
   0xe   : > { %v297_v0 = vld [vmem:[%s1131_s1 + $0x80] sm:$0xff] (!%p221_p10)  ;;  %v298_v1 = vld [vmem:[%s1131_s1 + $0x88] sm:$0xff] (!%p221_p10)  ;;  %p258_p11 = scmp.lt.s32.totalorder (!%p221_p10), %s867_s21, 1  ;;  %v299_v5 = vld [vmem:[%s1131_s1 + $0x90] sm:$0xff] (!%p221_p10)  ;;  %vm277_vm0 = vcmask (!%p221_p10), 27648   ;;  %v877_v50 = vmov (!%p221_p10), 0.0  }
   0xf   : > { %224 = sbr.rel (%p221_p10) target bundleno = 906 (0x38a), region = 40  ;;  %v281_v2 = vld [vmem:[%s1131_s1] sm:$0xff] (!%p221_p10)  ;;  %v700_v3 = vpack.c.bf16 (!%p221_p10), %v298_v1, %v297_v0  ;;  %v282_v4 = vld [vmem:[%s1131_s1 + $0x8] sm:$0xff] (!%p221_p10)  ;;  %v300_v6 = vld [vmem:[%s1131_s1 + $0x98] sm:$0xff] (!%p221_p10)  ;;  %278 = vst.msk [vmem:[#allocation2] sm:$0xf] (!%p221_p10), %vm277_vm0, %v877_v50  ;;  %695 = vmatprep.subr.mxu1 (!%p221_p10), %v877_v50 }
  0x10   : > { %v702_v7 = vpack.c.bf16 (!%p221_p10), %v282_v4, %v281_v2  ;;  %v704_v8 = vpack.c.bf16 (!%p221_p10), %v300_v6, %v299_v5  ;;  %v283_v9 = vld [vmem:[%s1131_s1 + $0x10] sm:$0xff] (!%p221_p10)  ;;  %v284_v10 = vld [vmem:[%s1131_s1 + $0x18] sm:$0xff] (!%p221_p10)  ;;  %v301_v11 = vld [vmem:[%s1131_s1 + $0xa0] sm:$0xff] (!%p221_p10)  ;;  %vm445_vm1 = vcmask (!%p221_p10), 1043456   ;;  %vm878_vm2 = vmmov (!%p221_p10), 0   ;;  %s654_s12 = sshll.u32 (!%p221_p10), %s867_s21, 6 }
  0x11   : > { %701 = vmatprep.subr.bf16.mxu0 (!%p221_p10), %v700_v3  ;;  %v302_v12 = vld [vmem:[%s1131_s1 + $0xa8] sm:$0xff] (!%p221_p10)  ;;  %v706_v13 = vpack.c.bf16 (!%p221_p10), %v284_v10, %v283_v9  ;;  %v285_v15 = vld [vmem:[%s1131_s1 + $0x20] sm:$0xff] (!%p221_p10)  ;;  %v303_v17 = vld [vmem:[%s1131_s1 + $0xb0] sm:$0xff] (!%p221_p10)  ;;  %697 = vmatprep.mubr.msk.f32.mxu1 (!%p221_p10), %vm878_vm2, %v877_v50  ;;  %vm441_vm3 = vcmask (!%p221_p10), 31744   ;;  %vm520_vm4 = vcmask (!%p221_p10), 60416  }
  0x12   : > { %703 = vmatpush3.bf16.msra.mxu0 (!%p221_p10), %v702_v7  ;;  %v708_v14 = vpack.c.bf16 (!%p221_p10), %v302_v12, %v301_v11  ;;  %v286_v16 = vld [vmem:[%s1131_s1 + $0x28] sm:$0xff] (!%p221_p10)  ;;  %v304_v18 = vld [vmem:[%s1131_s1 + $0xb8] sm:$0xff] (!%p221_p10)  ;;  %v287_v21 = vld [vmem:[%s1131_s1 + $0x30] sm:$0xff] (!%p221_p10)  ;;  %s879_s8 = smov (!%p221_p10), 1e-24  }
  0x13   : > { %705 = vmatprep.subr.bf16.mxu0 (!%p221_p10), %v704_v8  ;;  %v710_v19 = vpack.c.bf16 (!%p221_p10), %v286_v16, %v285_v15  ;;  %v712_v20 = vpack.c.bf16 (!%p221_p10), %v304_v18, %v303_v17  ;;  %v288_v22 = vld [vmem:[%s1131_s1 + $0x38] sm:$0xff] (!%p221_p10)  ;;  %v305_v23 = vld [vmem:[%s1131_s1 + $0xc0] sm:$0xff] (!%p221_p10)  ;;  %v306_v24 = vld [vmem:[%s1131_s1 + $0xc8] sm:$0xff] (!%p221_p10) }
  0x14   : > { %v714_v27 = vpack.c.bf16 (!%p221_p10), %v288_v22, %v287_v21  ;;  %v716_v28 = vpack.c.bf16 (!%p221_p10), %v306_v24, %v305_v23  ;;  %v289_v29 = vld [vmem:[%s1131_s1 + $0x40] sm:$0xff] (!%p221_p10)  ;;  %v290_v30 = vld [vmem:[%s1131_s1 + $0x48] sm:$0xff] (!%p221_p10)  ;;  %v307_v31 = vld [vmem:[%s1131_s1 + $0xd0] sm:$0xff] (!%p221_p10) }
  0x15   : > { %v308_v32 = vld [vmem:[%s1131_s1 + $0xd8] sm:$0xff] (!%p221_p10)  ;;  %v718_v33 = vpack.c.bf16 (!%p221_p10), %v290_v30, %v289_v29  ;;  %v291_v35 = vld [vmem:[%s1131_s1 + $0x50] sm:$0xff] (!%p221_p10)  ;;  %v309_v37 = vld [vmem:[%s1131_s1 + $0xe0] sm:$0xff] (!%p221_p10) }
  0x16   : > { %s259_s10 = scalar_select %p258_p11, %s867_s21, 1  ;;  %707 = vmatpush3.bf16.msra.mxu0 %v706_v13  ;;  %v720_v34 = vpack.c.bf16 %v308_v32, %v307_v31  ;;  %v292_v36 = vld [vmem:[%s1131_s1 + $0x58] sm:$0xff]  ;;  %v310_v38 = vld [vmem:[%s1131_s1 + $0xe8] sm:$0xff]  ;;  %v293_v41 = vld [vmem:[%s1131_s1 + $0x60] sm:$0xff] }
  0x17   : > { %709 = vmatprep.subr.bf16.mxu0 %v708_v14  ;;  %v722_v39 = vpack.c.bf16 %v292_v36, %v291_v35  ;;  %v724_v40 = vpack.c.bf16 %v310_v38, %v309_v37  ;;  %v294_v42 = vld [vmem:[%s1131_s1 + $0x68] sm:$0xff]  ;;  %v311_v43 = vld [vmem:[%s1131_s1 + $0xf0] sm:$0xff]  ;;  %v312_v44 = vld [vmem:[%s1131_s1 + $0xf8] sm:$0xff]  ;;  %s880_s21 = smov [#allocation3]  }
  0x18   : > { %s657_s13 = sshll.u32 %s259_s10, 3  ;;  %v726_v45 = vpack.c.bf16 %v294_v42, %v293_v41  ;;  %v728_v46 = vpack.c.bf16 %v312_v44, %v311_v43  ;;  %v295_v47 = vld [vmem:[%s1131_s1 + $0x70] sm:$0xff]  ;;  %v296_v48 = vld [vmem:[%s1131_s1 + $0x78] sm:$0xff]  ;;  %v401_v51 = vld [vmem:[%s1133_s3] sm:$0xf]  ;;  %s801_s29 = sshll.u32 %s880_s21, 4  ;;  %s802_s29 = int_to_ptr.vmem [resolvable:$false] %s801_s29 }
  0x19   : > { %s265_s9 = scalar_lea.vmem %s1130_s0, %s657_s13  ;;  %v730_v49 = vpack.c.bf16 %v296_v48, %v295_v47  ;;  %696 = vmatpush3.msk.msra.mxu1 %vm445_vm1, %v401_v51  ;;  %v279_v53 = vld [vmem:[#allocation2] sm:$0xf]  ;;  %s1082_s13 = scalar_lea.hbm %s1135_s5, %s654_s12 }
  0x1a   : > { %v280_v25 = vld [vmem:[%s265_s9] sm:$0xff]  ;;  %711 = vmatpush3.bf16.msra.mxu0 %v710_v19  ;;  %s254_s9 = sand.u32 1, %s859_s19  }
  0x1b   : > { %v314_v26 = vcombine.high %v280_v25, %v280_v25  ;;  %713 = vmatprep.subr.bf16.mxu0 %v712_v20  ;;  %v649_v57 = vld [vmem:[%s1132_s2] ss:$0 sm:$0xff]  ;;  %s646_s11 = sshll.u32 %s254_s9, 2  ;;  %s539_s25 = scalar_lea.sflag [#allocation4], %s254_s9 }
  0x1c   : > { %v650_v61 = vld [vmem:[%s1134_s4] ss:$0 sm:$0xff]  ;;  %s256_s14 = scalar_lea.vmem [#allocation3], %s646_s11 }
  0x1d   : > { %380 = vmatprep.mubr.f32.mxu0 %v314_v26  ;;  %s552_s15 = sshll.u32 %s256_s14, 4  ;;  %s1084_s15 = int_to_ptr.vmem [resolvable:$true] %s552_s15 }
  0x1e   : > { %715 = vmatpush3.bf16.msra.mxu0 %v714_v27  ;;  %s797_s27 = scalar_lea.vmem %s1084_s15, 64  ;;  %p804_p1 = scmp.lt.s32.totalorder %s1084_s15, %s802_s29 }
  0x1f   : > { %717 = vmatprep.subr.bf16.mxu0 %v716_v28  ;;  %p798_p12 = scmp.ne.s32.totalorder %s1084_s15, %s797_s27 }
  0x21   : > { %p799_p13 = pnand %p798_p12, %p951_p4 }
  0x22   : > { %719 = vmatpush3.bf16.msra.mxu0 %v718_v33 }
  0x23   : > { %721 = vmatprep.subr.bf16.mxu0 %v720_v34  ;;  %p800_p0 = pneg %p799_p13 }
  0x26   : > { %723 = vmatpush3.bf16.msra.mxu0 %v722_v39 }
  0x27   : > { %725 = vmatprep.subr.bf16.mxu0 %v724_v40 }
  0x2a   : > { %727 = vmatpush3.bf16.msra.mxu0 %v726_v45 }
  0x2b   : > { %729 = vmatprep.subr.bf16.mxu0 %v728_v46 }
  0x2e   : > { %731 = vmatpush3.bf16.msra.mxu0 %v730_v49 }
  0x31   : > { %381 = vmatmul.mubr.f32.vlgmr.msra.gmra.mrb[0].mxu0 %v280_v25 }
 0x104   : > { %v690_v52 = vpop.f32.mrb[0].mxu0 }
 0x105   : > { %v691_v54 = vpop.f32.mrb[1].mxu0 }
 0x106   : > { %v692_v55 = vadd.f32 %v691_v54, %v690_v52 }
 0x108   : > { %v386_v56 = vadd.f32 %v692_v55, %v279_v53 }
 0x10a   : > { %388 = vst.msk [vmem:[#allocation2] sm:$0xf] %vm277_vm0, %v386_v56 }
 0x111   : > { %v392_v58 = vld [vmem:[#allocation2] sm:$0xf] }
 0x112   : > { %v400_v59 = vmul.f32 %v649_v57, %v392_v58 }
 0x114   : > { %409 = vxpose.xlu0.b32.start.end [1/1] (short) (narrow) %v400_v59, 8 }
 0x194   : > { %v425_v60 = vpop.trf.xlu0 }
 0x195   : > { %698 = vmatmul.mubr.msk.f32.vlgmr.msra.gmra.mrb[0].mxu1 %vm441_vm3, %v425_v60 }
 0x268   : > { %v515_v62 = vpop.f32.mrb[0].mxu1 }
 0x269   : > { %v516_v63 = vadd.f32 %v650_v61, %v515_v62  ;;  %v699_v0 = vpop.f32.mrb[1].mxu1 }
 0x26b   : > { %v519_v1 = vmul.f32 %v516_v63, %v516_v63 }
 0x26d   : > { %v521_v2 = vsel %vm520_vm4, %v519_v1, 0.0 }
 0x26e   : > { %522 = vadd.xlane.f32.xlu0 %v521_v2 }
 0x2fb   : > { %v523_v3 = vpop.xlane.xlu0 %522 }
 0x2fc   : > { %v524_v4 = vrot.slane %v523_v3, 4 }
 0x2fe   : > { %v525_v5 = vadd.f32 %v524_v4, %v523_v3 }
 0x300   : > { %v526_v6 = vrot.slane %v525_v5, 2 }
 0x302   : > { %v527_v7 = vadd.f32 %v526_v6, %v525_v5 }
 0x304   : > { %v528_v8 = vrot.slane %v527_v7, 1 }
 0x306   : > { %v529_v9 = vadd.f32 %v528_v8, %v527_v7 }
 0x308   : > { %732 = vpush %v529_v9 }
 0x339   : > { %s733_s7 = spop %732 }
 0x33a   : > { %s531_s10 = smax.f32 %s879_s8, %s733_s7  ;;  %s803_s7 = scalar_lea.vmem %s802_s29, 128 }
 0x33b   : > { %v532_v10 = vstv %s531_s10  ;;  %p805_p2 = scmp.lt.s32.totalorder %s803_s7, %s797_s27 }
 0x33c   : > { %795 = vrsqrt.f32 %v532_v10 }
 0x33d   : > { %p806_p3 = por %p805_p2, %p804_p1 }
 0x33f   : > { %p807_p5 = pnand %p806_p3, %p800_p0 }
 0x346   : > { %v796_v11 = vpop.eup %795 }
 0x347   : > { %734 = vpush %v796_v11 }
 0x378   : > { %s735_s16 = spop %734 }
 0x379   : > { %v535_v12 = vstv %s735_s16 }
 0x37a   : > { %v536_v13 = vmul.f32 %v535_v12, %v516_v63 }
 0x37c   : > { %537 = vst.msk [vmem:[%s256_s14] sm:$0xf] %vm520_vm4, %v536_v13 }
 0x37d   : > { %810 = shalt.err (!%p807_p5)
}
 0x37e   : > { %s811_s8 = scalar_lea.hbm %s1082_s13, 64  ;;  %s815_s11 = scalar_lea.hbm %s1135_s5, 128 }
 0x37f   : > { %p812_p6 = scmp.ne.s32.totalorder %s1082_s13, %s811_s8  ;;  %p816_p10 = scmp.lt.u32.totalorder %s1082_s13, %s1135_s5 }
 0x380   : > { %p817_p11 = scmp.lt.u32.totalorder %s815_s11, %s811_s8  ;;  %p819_p13 = scmp.lt.u32.totalorder %s811_s8, %s1082_s13 }
 0x381   : > { %p813_p7 = pnand %p812_p6, %p951_p4 }
 0x382   : > { %p818_p12 = por %p817_p11, %p816_p10 }
 0x383   : > { %p814_p9 = pneg %p813_p7 }
 0x384   : > { %p820_p0 = por %p819_p13, %p818_p12 }
 0x386   : > { %p821_p1 = pnand %p820_p0, %p814_p9 }
 0x388   : > { %824 = shalt.err (!%p821_p1)
}
 0x389   : > { %736 = dma.vmem_to_hbm [thread:$0]  (%p951_p4), %s1084_s15, 64, %s1082_s13, %s539_s25  }
 0x38a PF: > { %p742_p2 = scmp.ge.s32.totalorder %s875_s23, 2  ;;  %s564_s16 = sand.u32 1, %s855_s18  }
 0x38b   : > { %s565_s17 = scalar_lea.sflag [#allocation4], %s564_s16 }
 0x38c   : > { %p739_p3 = pnand %p742_p2, %p958_p8 }
 0x38e   : > { %850 = dma.done.wait (!%p739_p3), %s565_s17, 64  }
 0x38f   : > { %852 = vsyncadd (!%p739_p3), %s565_s17, 4294967232  ;;  %s18_s23 = sadd.s32 1, %s875_s23   ;;  %s1138_s18 = smov %s859_s19 }
 0x390   : > { %p15_p5 = scmp.ge.s32.totalorder %s18_s23, 4   ;;  %s1139_s19 = smov %s863_s20 }
 0x391   : > { %s1140_s20 = smov %s964_s6  ;;  %s1141_s21 = smov %s871_s22 }
 0x392   : > { %s1142_s22 = smov %s1144_s26  ;;  %17 = sbr.rel (!%p15_p5) target bundleno = 4 (0x4), region = 86 }
 0x399   :  { %570 = vsyncpa [#allocation4], 1 }
 0x39a   :  { %572 = vsyncpa [#allocation4 + $0x1], 1 }

</bundles_post_ra>
